<compile_context>
chip_gen: v7x
topology: tpu7x:2x2x1
jax: 0.10.0
libtpu: 0.0.40
codegen_flags: <defaults>
</compile_context>

<pallas_src>
import numpy as np
import jax
import jax.numpy as jnp
from jax import lax
from jax.experimental import pallas as pl
from jax.experimental.pallas import tpu as pltpu


def _downsample_kernel(p_ref, w_ref, b_ref, o_ref):
    # p_ref: (1, K, tile_s)       transposed patches for one batch element
    # w_ref: (C_out, K)           flattened conv weight (resident across grid)
    # b_ref: (C_out, 1)           bias (resident)
    # o_ref: (1, C_out, tile_s)   lane-dense output block
    acc = jnp.dot(w_ref[...], p_ref[0], preferred_element_type=jnp.float32)
    o_ref[0] = (acc + b_ref[...]).astype(o_ref.dtype)


def _pick_tile_s(S, K, C_out, dtype_bytes, budget_bytes=24 * 1024 * 1024):
    """Largest lane tile (multiple of 128, capped at 512) whose pipelined VMEM
    footprint fits the budget; falls back to full S for small inputs."""
    if S <= 512:
        return S
    tile = 512
    while tile > 128:
        need = dtype_bytes * (2 * K * tile + 2 * C_out * tile + 2 * C_out * K + C_out)
        if need <= budget_bytes:
            break
        tile -= 128
    return tile


def downsample_layer(x, weight, bias, factor):
    """Conv2d(in_dim, out_dim, kernel_size=factor, stride=factor) forward.

    x:      (N, C_in, H, W)   NCHW
    weight: (C_out, C_in, f, f)
    bias:   (C_out,)
    returns (N, C_out, H//f, W//f)   NCHW
    """
    N, C_in, H, W = x.shape
    C_out = weight.shape[0]
    f = int(factor)

    # PyTorch Conv2d with stride=f drops remainder rows/cols — crop explicitly.
    H_out, W_out = H // f, W // f
    if H_out * f != H or W_out * f != W:
        x = x[:, :, : H_out * f, : W_out * f]

    K = C_in * f * f
    S = H_out * W_out

    # --- input-side glue (XLA): free reshape + one transpose -> (N, K, S) ---
    xp = x.reshape(N, C_in, H_out, f, W_out, f)
    xp = jnp.transpose(xp, (0, 1, 3, 5, 2, 4))       # (N, C_in, f, f, H_out, W_out)
    patches_t = xp.reshape(N, K, S)                  # K on sublanes, spatial S on lanes

    w_flat = weight.reshape(C_out, K).astype(x.dtype)   # same (ci, dy, dx) order
    b_col = bias.reshape(C_out, 1).astype(x.dtype)

    dtype_bytes = jnp.dtype(x.dtype).itemsize
    tile_s = _pick_tile_s(S, K, C_out, dtype_bytes)
    grid = (N, pl.cdiv(S, tile_s))

    cost = pl.CostEstimate(
        flops=2 * N * S * K * C_out,
        transcendentals=0,
        bytes_accessed=dtype_bytes * (N * K * S + C_out * K + C_out + N * C_out * S),
    )

    # VMEM budget: double-buffered patch + output blocks, resident weight/bias.
    vmem_need = dtype_bytes * (2 * K * tile_s + 2 * C_out * tile_s + 2 * C_out * K + C_out)
    vmem_limit = None
    if vmem_need > 24 * 1024 * 1024:                 # only override when actually needed
        vmem_limit = int(min(2 * vmem_need, 64 * 1024 * 1024))   # within v7x VMEM

    out_t = pl.pallas_call(
        _downsample_kernel,
        out_shape=jax.ShapeDtypeStruct((N, C_out, S), x.dtype),
        grid_spec=pltpu.PrefetchScalarGridSpec(
            num_scalar_prefetch=0,
            grid=grid,
            in_specs=[
                pl.BlockSpec((1, K, tile_s), lambda n, s: (n, 0, s)),
                pl.BlockSpec((C_out, K), lambda n, s: (0, 0)),
                pl.BlockSpec((C_out, 1), lambda n, s: (0, 0)),
            ],
            out_specs=pl.BlockSpec((1, C_out, tile_s), lambda n, s: (n, 0, s)),
        ),
        compiler_params=pltpu.CompilerParams(
            dimension_semantics=("parallel", "parallel"),
            vmem_limit_bytes=vmem_limit,
        ),
        cost_estimate=cost,
    )(patches_t, w_flat, b_col)

    # --- output-side: free reshape only, no transpose ---
    return out_t.reshape(N, C_out, H_out, W_out)


if __name__ == "__main__":
    # Small shapes consistent with the module's forward.
    N, C_in, H, W = 2, 4, 16, 16
    C_out, factor = 8, 2

    key = jax.random.PRNGKey(0)
    kx, kw, kb = jax.random.split(key, 3)

    x = jax.random.normal(kx, (N, C_in, H, W), dtype=jnp.float32)

    # Deterministic parameter init mimicking nn.Conv2d default (uniform +-1/sqrt(fan_in)).
    fan_in = C_in * factor * factor
    bound = 1.0 / np.sqrt(fan_in)
    weight = jax.random.uniform(kw, (C_out, C_in, factor, factor),
                                dtype=jnp.float32, minval=-bound, maxval=bound)
    bias = jax.random.uniform(kb, (C_out,), dtype=jnp.float32,
                              minval=-bound, maxval=bound)

    out = downsample_layer(x, weight, bias, factor)
    out = jax.block_until_ready(out)

    # Reference check with XLA's conv (NCHW, OIHW), stride = kernel = factor.
    ref = lax.conv_general_dilated(
        x, weight, window_strides=(factor, factor), padding="VALID",
        dimension_numbers=("NCHW", "OIHW", "NCHW"),
    ) + bias.reshape(1, C_out, 1, 1)
    ref = jax.block_until_ready(ref)

    assert out.shape == (N, C_out, H // factor, W // factor)
    np.testing.assert_allclose(np.asarray(out), np.asarray(ref), rtol=1e-5, atol=1e-5)

    print("KERNEL_OK")
</pallas_src>

<mosaic_0001>
module attributes {stable_mosaic.version = 11 : i64} {
  func.func @_downsample_kernel(%arg0: i32, %arg1: i32, %arg2: memref<1x16x64xf32, #tpu.memory_space<vmem>>, %arg3: memref<8x16xf32, #tpu.memory_space<vmem>>, %arg4: memref<8x1xf32, #tpu.memory_space<vmem>>, %arg5: memref<1x8x64xf32, #tpu.memory_space<vmem>>) attributes {dimension_semantics = [#tpu.dimension_semantics<parallel>, #tpu.dimension_semantics<parallel>], iteration_bounds = array<i64: 2, 1>, scalar_prefetch = 0 : i64, scratch_operands = 0 : i64, tpu.core_type = #tpu.core_type<tc>, window_params = [{transform_indices = @transform_0, window_bounds = array<i64: 1, 16, 64>}, {pipeline_mode = #tpu.pipeline_mode<synchronous>, transform_indices = @transform_1, window_bounds = array<i64: 8, 16>}, {pipeline_mode = #tpu.pipeline_mode<synchronous>, transform_indices = @transform_2, window_bounds = array<i64: 8, 1>}, {transform_indices = @transform_3, window_bounds = array<i64: 1, 8, 64>}]} {
    %c0 = arith.constant 0 : index
    %c0_0 = arith.constant 0 : index
    %0 = vector.load %arg3[%c0, %c0_0] : memref<8x16xf32, #tpu.memory_space<vmem>>, vector<8x16xf32>
    %c0_1 = arith.constant 0 : index
    %c0_2 = arith.constant 0 : index
    %c0_3 = arith.constant 0 : index
    %1 = vector.load %arg2[%c0_1, %c0_2, %c0_3] : memref<1x16x64xf32, #tpu.memory_space<vmem>>, vector<1x16x64xf32>
    %2 = vector.shape_cast %1 : vector<1x16x64xf32> to vector<16x64xf32>
    %cst = arith.constant dense<0.000000e+00> : vector<8x64xf32>
    %3 = tpu.matmul %0, %2, %cst {dimension_numbers = #tpu.dot_dimension_numbers<[1], [0], [0], [1], [0, 0, 1, 1], [], []>} : vector<8x16xf32>, vector<16x64xf32>, vector<8x64xf32> -> vector<8x64xf32>
    %c0_4 = arith.constant 0 : index
    %c0_5 = arith.constant 0 : index
    %4 = vector.load %arg4[%c0_4, %c0_5] : memref<8x1xf32, #tpu.memory_space<vmem>>, vector<8x1xf32>
    %5 = vector.broadcast %4 : vector<8x1xf32> to vector<8x64xf32>
    %6 = arith.addf %3, %5 : vector<8x64xf32>
    %c0_6 = arith.constant 0 : index
    %c0_7 = arith.constant 0 : index
    %c0_8 = arith.constant 0 : index
    %7 = vector.load %arg5[%c0_6, %c0_7, %c0_8] : memref<1x8x64xf32, #tpu.memory_space<vmem>>, vector<1x8x64xf32>
    %8 = vector.shape_cast %7 : vector<1x8x64xf32> to vector<8x64xf32>
    %9 = vector.shape_cast %6 : vector<8x64xf32> to vector<1x8x64xf32>
    tpu.vector_store %arg5[%c0_6, %c0_7, %c0_8], %9 {strides = array<i32>} : memref<1x8x64xf32, #tpu.memory_space<vmem>>, vector<1x8x64xf32>,
    return
  }
  func.func @transform_0(%arg0: i32, %arg1: i32) -> (i32, i32, i32) {
    %c0_i32 = arith.constant 0 : i32
    %c0_i32_0 = arith.constant 0 : i32
    return %arg0, %c0_i32, %arg1 : i32, i32, i32
  }
  func.func @transform_1(%arg0: i32, %arg1: i32) -> (i32, i32) {
    %c0_i32 = arith.constant 0 : i32
    %c0_i32_0 = arith.constant 0 : i32
    %c0_i32_1 = arith.constant 0 : i32
    return %c0_i32, %c0_i32_0 : i32, i32
  }
  func.func @transform_2(%arg0: i32, %arg1: i32) -> (i32, i32) {
    %c0_i32 = arith.constant 0 : i32
    %c0_i32_0 = arith.constant 0 : i32
    %c0_i32_1 = arith.constant 0 : i32
    return %c0_i32, %c0_i32_0 : i32, i32
  }
  func.func @transform_3(%arg0: i32, %arg1: i32) -> (i32, i32, i32) {
    %c0_i32 = arith.constant 0 : i32
    %c0_i32_0 = arith.constant 0 : i32
    return %arg0, %c0_i32, %arg1 : i32, i32, i32
  }
}

</mosaic_0001>

<bundles_post_ra>
// kernel: tpu_custom_call.1
= control target key start
LH: loop header
LB: loop body
LE: loop exit
PB: predicated region body
PF: predicated region fallthrough
CT: control target
= control target key end

     0   :  { %8 = vsyncpa [#allocation3], 0  ;;  %s807_s0 = inlined_call_operand.hbm [shape: f32[2,16,64], index: 0, kind: input, shape index: {}]   ;;  %s808_s1 = inlined_call_operand.vmem [shape: f32[8,16], index: 1, kind: input, shape index: {}]   ;;  %s809_s2 = inlined_call_operand.vmem [shape: f32[8,1], index: 2, kind: input, shape index: {}]   ;;  %s810_s3 = inlined_call_operand.hbm [shape: f32[2,8,64], index: 3, kind: output, shape index: {}]  }
   0x1   :  { %10 = vsyncpa [#allocation3 + $0x1], 0 }
   0x2   :  { %11 = vsyncpa [#allocation4], 0 }
   0x3   :  { %13 = vsyncpa [#allocation4 + $0x1], 0  ;;  %s627_s12 = smov 0   ;;  %s629_s13 = smov 0  }
   0x4   :  { %s631_s14 = smov 0   ;;  %s633_s15 = smov 0  }
   0x5   :  { %s635_s16 = smov 0   ;;  %s637_s17 = smov 0  }
   0x6 LB: > { %s387_s18 = sadd.s32 4294967295, %s597_s17   ;;  %s388_s19 = sadd.s32 4294967294, %s597_s17   ;;  %s597_s17 = sphi %s637_s17, %s19_s17   ;;  %s593_s16 = sphi %s635_s16, %s825_s16   ;;  %s589_s15 = sphi %s633_s15, %s824_s15   ;;  %s585_s14 = sphi %s631_s14, %s823_s14   ;;  %s581_s13 = sphi %s629_s13, %s822_s13   ;;  %s577_s12 = sphi %s627_s12, %s821_s12  }
   0x7   : > { %s31_s20 = sadd.s32 1, %s593_s16  ;;  %s40_s21 = sadd.s32 1, %s585_s14 }
   0x8   : > { %p33_p0 = scmp.ge.s32.totalorder %s31_s20, 2  ;;  %p47_p1 = scmp.ne.s32.totalorder %s585_s14, %s581_s13 }
   0x9   : > { %p48_p2 = scmp.eq.s32.totalorder %s597_s17, 0  ;;  %p53_p3 = scmp.ne.s32.totalorder %s581_s13, %s577_s12 }
   0xa   : > { %s827_s20 = smov (%p33_p0, %s31_s20), 0  ;;  %p54_p5 = scmp.eq.s32.totalorder %s387_s18, 0 }
   0xb   : > { %p668_p4 = por %p48_p2, %p47_p1  ;;  %s35_s23 = ssub.s32 %s593_s16, %s827_s20 }
   0xc   : > { %p121_p6 = scmp.eq.s32.totalorder %s387_s18, 1  ;;  %p38_p7 = scmp.eq.s32.totalorder %s35_s23, 0 }
   0xd   : > { %p674_p8 = por %p54_p5, %p53_p3  ;;  %p127_p10 = scmp.eq.s32.totalorder %s388_s19, 1 }
   0xe   : > { %p678_p9 = por %p121_p6, %p47_p1  ;;  %p428_p13 = scmp.lt.s32.totalorder %s597_s17, 2 }
   0xf   : > { %s683_s26 = scalar_select %p38_p7, %s585_s14, %s40_s21  }
  0x10   : > { %s814_s25 = scalar_select %p678_p9, 1, 0 }
  0x11   : > { %p685_p11 = por %p127_p10, %p53_p3  ;;  %s153_s28 = sand.u32 1, %s585_s14  }
  0x12   : > { %s391_s29 = sshll.u32 %s153_s28, 4  ;;  %s402_s30 = sshll.u32 %s593_s16, 8 }
  0x13   : > { %s815_s27 = scalar_select %p685_p11, 1, 0 }
  0x14   : > { %s696_s6 = scalar_lea.hbm %s807_s0, %s402_s30  ;;  %s157_s7 = scalar_lea.vmem [#allocation2], %s391_s29 }
  0x15   : > { %s165_s8 = sshll.u32 %s157_s7, 4  ;;  %p702_p0 = pnand %p428_p13, %p668_p4  ;;  %s698_s8 = int_to_ptr.vmem [resolvable:$true] %s165_s8 }
  0x16   : > { %s707_s10 = scalar_lea.sflag [#allocation3], %s153_s28  ;;  %s485_s11 = scalar_lea.hbm %s696_s6, 256 }
  0x17   : > { %p486_p2 = scmp.ne.s32.totalorder %s696_s6, %s485_s11  ;;  %p487_p3 = pneg %p702_p0 }
  0x18   : > { %s490_s21 = scalar_lea.hbm %s807_s0, 512  ;;  %p491_p4 = scmp.lt.u32.totalorder %s696_s6, %s807_s0 }
  0x19   : > { %p488_p5 = pnand %p487_p3, %p486_p2  ;;  %p492_p7 = scmp.lt.u32.totalorder %s490_s21, %s485_s11 }
  0x1a   : > { %p494_p13 = scmp.lt.u32.totalorder %s485_s11, %s696_s6 }
  0x1b   : > { %p489_p6 = pneg %p488_p5  ;;  %p493_p10 = por %p492_p7, %p491_p4 }
  0x1d   : > { %p495_p12 = por %p494_p13, %p493_p10 }
  0x1f   : > { %p496_p1 = pnand %p495_p12, %p489_p6 }
  0x21   : > { %499 = shalt.err (!%p496_p1)
}
  0x22   : > { %s500_s28 = scalar_lea.vmem %s698_s8, 256  ;;  %s599_s29 = smov [#allocation2]  }
  0x23   : > { %p501_p2 = scmp.ne.s32.totalorder %s698_s8, %s500_s28  ;;  %s505_s30 = sshll.u32 %s599_s29, 4  ;;  %s506_s30 = int_to_ptr.vmem [resolvable:$false] %s505_s30 }
  0x24   : > { %s507_s4 = scalar_lea.vmem %s506_s30, 512  ;;  %p508_p9 = scmp.lt.s32.totalorder %s698_s8, %s506_s30 }
  0x25   : > { %p503_p5 = pnand %p501_p2, %p487_p3  ;;  %p509_p4 = scmp.lt.s32.totalorder %s507_s4, %s500_s28 }
  0x27   : > { %p504_p11 = pneg %p503_p5  ;;  %p510_p7 = por %p509_p4, %p508_p9 }
  0x29   : > { %p511_p10 = pnand %p510_p7, %p504_p11 }
  0x2b   : > { %514 = shalt.err (!%p511_p10)
}
  0x2c   : > { %s600_s5 = smov 128   ;;  %s601_s7 = smov 8  }
  0x2d   : > { %423 = dma.hbm_to_vmem [thread:$0]  (!%p702_p0), %s696_s6, 256, %s698_s8, %s707_s10, %s600_s5, %s600_s5, %s601_s7  }
  0x2e   : > { %p173_p12 = scmp.lt.s32.totalorder %s597_s17, 3  ;;  %p817_p1 = scmp.ge.s32.totalorder %s597_s17, 1 }
  0x30   : > { %p174_p3 = pnand %p817_p1, %p173_p12 }
  0x31   : > { %s739_s11 = sand.u32 (!%p174_p3), 1, %s581_s13  }
  0x32   : > { %177 = sbr.rel (%p174_p3) target bundleno = 293 (0x125), region = 32  ;;  %s395_s18 = sshll.u32 (!%p174_p3), %s739_s11, 4 }
  0x33   : > { %s180_s19 = scalar_lea.sflag (!%p174_p3), [#allocation3], %s739_s11  ;;  %s183_s21 = scalar_lea.vmem (!%p174_p3), [#allocation2], %s395_s18 }
  0x39   : > { %568 = dma.done.wait (%p674_p8), %s180_s19, 256  }
  0x3a   : > { %570 = vsyncadd (%p674_p8), %s180_s19, 4294967040  ;;  %v602_v0 = vmov 0.0|0.0   ;;  %vm603_vm0 = vmmov 0   ;;  %v604_v1 = vmov 0.0   ;;  %v605_v2 = vmov 0   ;;  %v207_v3 = vld [vmem:[%s183_s21] sm:$0xff] }
  0x3b   : > { %413 = vmatprep.subr.bf16.mxu0 %v602_v0  ;;  %410 = vmatprep.mubr.msk.f32.mxu0 %vm603_vm0, %v604_v1  ;;  %v208_v4 = vld [vmem:[%s183_s21 + $0x8] sm:$0xff]  ;;  %v209_v6 = vld [vmem:[%s809_s2] sm:$0xff]  ;;  %vm215_vm1 = vcmask 130048   ;;  %s396_s10 = sshll.u32 %s739_s11, 3  ;;  %s399_s22 = sshll.u32 %s589_s15, 7  ;;  %vm289_vm2 = vcmask 523264  }
  0x3c   : > { %484 = vset.pattern.permute.xlu0 %v605_v2  ;;  %v414_v5 = vpack.c.bf16 %v208_v4, %v207_v3  ;;  %v206_v7 = vld [vmem:[%s808_s1] sm:$0xff]  ;;  %s205_s23 = scalar_lea.vmem [#allocation5], %s396_s10  ;;  %s758_s4 = scalar_lea.hbm %s810_s3, %s399_s22 }
  0x3d   : > { %212 = vperm.xlu0 %484, %v209_v6   ;;  %s306_s28 = sshll.u32 %s205_s23, 4  ;;  %s292_s5 = scalar_lea.sflag [#allocation4], %s739_s11  ;;  %s760_s28 = int_to_ptr.vmem [resolvable:$true] %s306_s28 }
  0x3e   : > { %415 = vmatpush3.bf16.msra.mxu0 %v414_v5  ;;  %s515_s7 = scalar_lea.vmem %s760_s28, 128  ;;  %p818_p9 = scmp.ne.s32.totalorder %s814_s25, 0 }
  0x3f   : > { %p516_p8 = scmp.ne.s32.totalorder %s760_s28, %s515_s7  ;;  %s606_s15 = smov [#allocation5]  }
  0x40   : > { %s519_s18 = sshll.u32 %s606_s15, 4  ;;  %s520_s18 = int_to_ptr.vmem [resolvable:$false] %s519_s18 }
  0x41   : > { %411 = vmatmul.mubr.msk.f32.vlgmr.msra.gmra.mrb[0].mxu0 %vm215_vm1, %v206_v7  ;;  %p517_p11 = pnand %p516_p8, %p818_p9  ;;  %s521_s19 = scalar_lea.vmem %s520_s18, 256 }
  0x42   : > { %p522_p6 = scmp.lt.s32.totalorder %s760_s28, %s520_s18  ;;  %p523_p13 = scmp.lt.s32.totalorder %s521_s19, %s515_s7 }
  0x43   : > { %p518_p0 = pneg %p517_p11 }
  0x44   : > { %p524_p2 = por %p523_p13, %p522_p6 }
  0x46   : > { %p525_p5 = pnand %p524_p2, %p518_p0 }
  0xbc   : > { %v213_v8 = vpop.permute.xlu0 %212 }
 0x114   : > { %v285_v9 = vpop.f32.mrb[0].mxu0 }
 0x115   : > { %v286_v10 = vadd.f32 %v285_v9, %v213_v8  ;;  %v412_v11 = vpop.f32.mrb[1].mxu0 }
 0x117   : > { %290 = vst.msk [vmem:[%s205_s23] sm:$0xff] %vm289_vm2, %v286_v10 }
 0x118   : > { %528 = shalt.err (!%p525_p5)
}
 0x119   : > { %s529_s11 = scalar_lea.hbm %s758_s4, 128  ;;  %s533_s8 = scalar_lea.hbm %s810_s3, 256 }
 0x11a   : > { %p530_p4 = scmp.ne.s32.totalorder %s758_s4, %s529_s11  ;;  %p534_p12 = scmp.lt.u32.totalorder %s758_s4, %s810_s3 }
 0x11b   : > { %p535_p1 = scmp.lt.u32.totalorder %s533_s8, %s529_s11  ;;  %p537_p8 = scmp.lt.u32.totalorder %s529_s11, %s758_s4 }
 0x11c   : > { %p531_p7 = pnand %p530_p4, %p818_p9 }
 0x11d   : > { %p536_p3 = por %p535_p1, %p534_p12 }
 0x11e   : > { %p532_p10 = pneg %p531_p7 }
 0x11f   : > { %p538_p11 = por %p537_p8, %p536_p3 }
 0x121   : > { %p539_p0 = pnand %p538_p11, %p532_p10 }
 0x123   : > { %542 = shalt.err (!%p539_p0)
}
 0x124   : > { %418 = dma.vmem_to_hbm [thread:$0]  (%p818_p9), %s760_s28, 128, %s758_s4, %s292_s5  }
 0x125 PF: > { %s318_s10 = sand.u32 1, %s577_s12   ;;  %p819_p6 = scmp.ne.s32.totalorder %s815_s27, 0 }
 0x126   : > { %p820_p13 = scmp.ge.s32.totalorder %s597_s17, 2  ;;  %s319_s22 = scalar_lea.sflag [#allocation4], %s318_s10 }
 0x128   : > { %p425_p2 = pnand %p820_p13, %p819_p6 }
 0x12a   : > { %572 = dma.done.wait (!%p425_p2), %s319_s22, 128  }
 0x12b   : > { %574 = vsyncadd (!%p425_p2), %s319_s22, 4294967168  ;;  %s19_s17 = sadd.s32 1, %s597_s17   ;;  %s821_s12 = smov %s581_s13 }
 0x12c   : > { %p16_p5 = scmp.ge.s32.totalorder %s19_s17, 4   ;;  %s822_s13 = smov %s585_s14 }
 0x12d   : > { %s823_s14 = smov %s683_s26  ;;  %s824_s15 = smov %s593_s16 }
 0x12e   : > { %s825_s16 = smov %s827_s20  ;;  %18 = sbr.rel (!%p16_p5) target bundleno = 6 (0x6), region = 77 }
 0x135   :  { %324 = vsyncpa [#allocation3], 1 }
 0x136   :  { %326 = vsyncpa [#allocation3 + $0x1], 1 }
 0x137   :  { %327 = vsyncpa [#allocation4], 1 }
 0x138   :  { %329 = vsyncpa [#allocation4 + $0x1], 1 }

</bundles_post_ra>
